<compile_context>
chip_gen: v7x
topology: tpu7x:2x2x1
jax: 0.10.0
libtpu: 0.0.40
codegen_flags: <defaults>
</compile_context>

<pallas_src>
import jax
import jax.numpy as jnp
from jax.experimental import pallas as pl
from jax.experimental.pallas import tpu as pltpu

IN_FEATURES = 28 * 28   # 784 (full array width -> no K padding needed)
HIDDEN = 128
OUT_FEATURES = 10
OUT_PAD = 128           # lane-dense output width (sliced back to 10 outside)
MAX_TILE_B = 2048       # sweet spot for v6e/v7x; fine on v5e with vmem bump


def _round_up(n: int, m: int) -> int:
    return (n + m - 1) // m * m


def _choose_tiling(B: int, max_tile: int = MAX_TILE_B):
    """Pick (tile_b, b_pad).

    Small batches: one full-array block (no batch padding, always legal).
    Large batches: multiple-of-16 tiles (native bf16 sublane packing for the
    streamed output blocks) chosen from divisors of the padded batch so the
    whole-array row pad is avoided, with >= 2 grid steps for v7x megacore.
    """
    b_pad = _round_up(B, 8)
    if b_pad <= max_tile and b_pad < 512:
        return b_pad, b_pad  # single block == full array

    b_pad = _round_up(B, 16)
    tile = 16
    limit = min(max_tile, b_pad // 2)      # force >= 2 grid steps (v7x 2 TCs)
    for d in range(16, limit + 1, 16):
        if b_pad % d == 0:
            tile = d
    # Pathological batch sizes with no decent divisor: accept a small row pad
    # instead of thousands of tiny grid steps (per-step overhead ~0.35 us).
    if tile < 256 and b_pad >= 2048:
        tile = min(1024, max_tile)
        b_pad = _round_up(b_pad, tile)
    return tile, b_pad


def mlp_kernel(x_ref, w1_ref, b1_ref, w2_ref, b2_ref, o_ref):
    # x streams as f32; cast to bf16 here (VPU, hidden under DMA) for the MXU.
    x = x_ref[...].astype(jnp.bfloat16)
    # fc1: (TILE_B, 784)bf16 @ (784, 128)bf16 -> f32 accumulate
    h = jnp.dot(x, w1_ref[...], preferred_element_type=jnp.float32)
    h = jnp.maximum(h + b1_ref[...], 0.0)                      # bias + ReLU in f32
    # fc2 (lane-dense padded N): (TILE_B, 128)bf16 @ (128, 128)bf16 -> f32
    y = jnp.dot(h.astype(jnp.bfloat16), w2_ref[...],
                preferred_element_type=jnp.float32)
    o_ref[...] = (y + b2_ref[...]).astype(o_ref.dtype)         # bf16 writeback


def simple_nn_forward(x_nchw, w1, b1, w2, b2, *, tile_b=None):
    """x_nchw: (B, 1, 28, 28) float32. w1: (784,128), b1: (128,),
    w2: (128,10), b2: (10,). Returns (B, 10) float32 logits."""
    B = x_nchw.shape[0]

    if tile_b is None:
        tile_b, b_pad = _choose_tiling(B)
    else:
        tile_b = max(8, _round_up(tile_b, 8))
        b_pad = _round_up(B, tile_b)
    n_tiles = b_pad // tile_b

    # ---- wrapper-side layout prep (no x materialization) ----
    # Flatten exactly like torch .reshape(-1, 784); stays f32 and unpadded
    # along K. Row padding only happens for ragged batch sizes.
    x = x_nchw.reshape(B, IN_FEATURES)
    if b_pad != B:
        x = jnp.pad(x, ((0, b_pad - B), (0, 0)))

    # Weights resident in VMEM as bf16; W1 keeps its natural (784, 128) shape.
    w1_b = w1.astype(jnp.bfloat16)
    b1_2d = b1.reshape(1, HIDDEN).astype(jnp.float32)
    # W2 / b2: zero-pad output columns 10 -> 128 for a lane-dense store.
    w2_p = jnp.pad(w2, ((0, 0), (0, OUT_PAD - OUT_FEATURES))).astype(jnp.bfloat16)
    b2_2d = jnp.pad(b2.reshape(1, OUT_FEATURES),
                    ((0, 0), (0, OUT_PAD - OUT_FEATURES))).astype(jnp.float32)

    # ---- cost hint so XLA schedules surrounding ops around us ----
    flops = 2 * b_pad * (IN_FEATURES * HIDDEN + HIDDEN * OUT_PAD)
    bytes_accessed = (x.size * 4 + w1_b.size * 2 + w2_p.size * 2
                      + b1_2d.size * 4 + b2_2d.size * 4
                      + b_pad * OUT_PAD * 2)
    cost = pl.CostEstimate(flops=flops, transcendentals=0,
                           bytes_accessed=bytes_accessed)

    out_padded = pl.pallas_call(
        mlp_kernel,
        out_shape=jax.ShapeDtypeStruct((b_pad, OUT_PAD), jnp.bfloat16),
        grid_spec=pltpu.PrefetchScalarGridSpec(
            num_scalar_prefetch=0,
            grid=(n_tiles,),
            in_specs=[
                pl.BlockSpec((tile_b, IN_FEATURES), lambda i: (i, 0)),  # x streams (f32)
                pl.BlockSpec((IN_FEATURES, HIDDEN), lambda i: (0, 0)),  # W1 resident
                pl.BlockSpec((1, HIDDEN), lambda i: (0, 0)),            # b1 resident
                pl.BlockSpec((HIDDEN, OUT_PAD), lambda i: (0, 0)),      # W2 resident
                pl.BlockSpec((1, OUT_PAD), lambda i: (0, 0)),           # b2 resident
            ],
            out_specs=pl.BlockSpec((tile_b, OUT_PAD), lambda i: (i, 0)),
        ),
        compiler_params=pltpu.CompilerParams(
            dimension_semantics=("parallel",),   # megacore on v7x; no-op on v5e/v6e
            vmem_limit_bytes=40 << 20,           # covers tile_b=2048 f32 x tiles on all gens
        ),
        cost_estimate=cost,
    )(x, w1_b, b1_2d, w2_p, b2_2d)

    # Strip batch padding + lane padding, restore f32 logits.
    return out_padded[:B, :OUT_FEATURES].astype(jnp.float32)


def init_params(key):
    """Deterministic init mimicking torch.nn.Linear's U(-1/sqrt(fan_in), ...)."""
    k1, k2, k3, k4 = jax.random.split(key, 4)
    bound1 = 1.0 / jnp.sqrt(jnp.float32(IN_FEATURES))
    bound2 = 1.0 / jnp.sqrt(jnp.float32(HIDDEN))
    # stored as (in, out) so the kernel computes x @ W (== torch's x @ W.T)
    w1 = jax.random.uniform(k1, (IN_FEATURES, HIDDEN), jnp.float32, -bound1, bound1)
    b1 = jax.random.uniform(k2, (HIDDEN,), jnp.float32, -bound1, bound1)
    w2 = jax.random.uniform(k3, (HIDDEN, OUT_FEATURES), jnp.float32, -bound2, bound2)
    b2 = jax.random.uniform(k4, (OUT_FEATURES,), jnp.float32, -bound2, bound2)
    return w1, b1, w2, b2


if __name__ == "__main__":
    key = jax.random.PRNGKey(0)
    k_x, k_p = jax.random.split(key)

    B = 8
    x = jax.random.normal(k_x, (B, 1, 28, 28), jnp.float32)   # NCHW MNIST batch
    w1, b1, w2, b2 = init_params(k_p)

    out = simple_nn_forward(x, w1, b1, w2, b2)
    out = jax.block_until_ready(out)

    # Pure-JAX f32 reference of the same math (kernel uses bf16 weights /
    # activations / logits -> loosened tolerance).
    x_flat = x.reshape(B, IN_FEATURES)
    ref = jnp.maximum(x_flat @ w1 + b1, 0.0) @ w2 + b2
    assert out.shape == (B, OUT_FEATURES)
    assert jnp.allclose(out, ref, atol=2e-2, rtol=2e-2), (
        float(jnp.max(jnp.abs(out - ref))))

    print("KERNEL_OK")
</pallas_src>

<mosaic_0001>
module attributes {stable_mosaic.version = 11 : i64} {
  func.func @mlp_kernel(%arg0: i32, %arg1: memref<8x784xf32, #tpu.memory_space<vmem>>, %arg2: memref<784x128xbf16, #tpu.memory_space<vmem>>, %arg3: memref<1x128xf32, #tpu.memory_space<vmem>>, %arg4: memref<128x128xbf16, #tpu.memory_space<vmem>>, %arg5: memref<1x128xf32, #tpu.memory_space<vmem>>, %arg6: memref<8x128xbf16, #tpu.memory_space<vmem>>) attributes {dimension_semantics = [#tpu.dimension_semantics<parallel>], iteration_bounds = array<i64: 1>, scalar_prefetch = 0 : i64, scratch_operands = 0 : i64, tpu.core_type = #tpu.core_type<tc>, window_params = [{transform_indices = @transform_0, window_bounds = array<i64: 8, 784>}, {pipeline_mode = #tpu.pipeline_mode<synchronous>, transform_indices = @transform_1, window_bounds = array<i64: 784, 128>}, {pipeline_mode = #tpu.pipeline_mode<synchronous>, transform_indices = @transform_2, window_bounds = array<i64: 1, 128>}, {pipeline_mode = #tpu.pipeline_mode<synchronous>, transform_indices = @transform_3, window_bounds = array<i64: 128, 128>}, {pipeline_mode = #tpu.pipeline_mode<synchronous>, transform_indices = @transform_4, window_bounds = array<i64: 1, 128>}, {transform_indices = @transform_5, window_bounds = array<i64: 8, 128>}]} {
    %c0 = arith.constant 0 : index
    %c0_0 = arith.constant 0 : index
    %0 = vector.load %arg1[%c0, %c0_0] : memref<8x784xf32, #tpu.memory_space<vmem>>, vector<8x784xf32>
    %1 = arith.truncf %0 : vector<8x784xf32> to vector<8x784xbf16>
    %c0_1 = arith.constant 0 : index
    %c0_2 = arith.constant 0 : index
    %2 = vector.load %arg2[%c0_1, %c0_2] : memref<784x128xbf16, #tpu.memory_space<vmem>>, vector<784x128xbf16>
    %cst = arith.constant dense<0.000000e+00> : vector<8x128xf32>
    %3 = tpu.matmul %1, %2, %cst {dimension_numbers = #tpu.dot_dimension_numbers<[1], [0], [0], [1], [0, 0, 1, 1], [], []>} : vector<8x784xbf16>, vector<784x128xbf16>, vector<8x128xf32> -> vector<8x128xf32>
    %c0_3 = arith.constant 0 : index
    %c0_4 = arith.constant 0 : index
    %4 = vector.load %arg3[%c0_3, %c0_4] : memref<1x128xf32, #tpu.memory_space<vmem>>, vector<1x128xf32>
    %5 = vector.broadcast %4 : vector<1x128xf32> to vector<8x128xf32>
    %6 = arith.addf %3, %5 : vector<8x128xf32>
    %cst_5 = arith.constant 0.000000e+00 : f32
    %7 = vector.broadcast %cst_5 : f32 to vector<8x128xf32>
    %8 = arith.maximumf %6, %7 : vector<8x128xf32>
    %9 = arith.truncf %8 : vector<8x128xf32> to vector<8x128xbf16>
    %c0_6 = arith.constant 0 : index
    %c0_7 = arith.constant 0 : index
    %10 = vector.load %arg4[%c0_6, %c0_7] : memref<128x128xbf16, #tpu.memory_space<vmem>>, vector<128x128xbf16>
    %cst_8 = arith.constant dense<0.000000e+00> : vector<8x128xf32>
    %11 = tpu.matmul %9, %10, %cst_8 {dimension_numbers = #tpu.dot_dimension_numbers<[1], [0], [0], [1], [0, 0, 1, 1], [], []>} : vector<8x128xbf16>, vector<128x128xbf16>, vector<8x128xf32> -> vector<8x128xf32>
    %c0_9 = arith.constant 0 : index
    %c0_10 = arith.constant 0 : index
    %12 = vector.load %arg5[%c0_9, %c0_10] : memref<1x128xf32, #tpu.memory_space<vmem>>, vector<1x128xf32>
    %13 = vector.broadcast %12 : vector<1x128xf32> to vector<8x128xf32>
    %14 = arith.addf %11, %13 : vector<8x128xf32>
    %15 = arith.truncf %14 : vector<8x128xf32> to vector<8x128xbf16>
    %c0_11 = arith.constant 0 : index
    %c0_12 = arith.constant 0 : index
    %16 = vector.load %arg6[%c0_11, %c0_12] : memref<8x128xbf16, #tpu.memory_space<vmem>>, vector<8x128xbf16>
    tpu.vector_store %arg6[%c0_11, %c0_12], %15 {strides = array<i32>} : memref<8x128xbf16, #tpu.memory_space<vmem>>, vector<8x128xbf16>,
    return
  }
  func.func @transform_0(%arg0: i32) -> (i32, i32) {
    %c0_i32 = arith.constant 0 : i32
    %c0_i32_0 = arith.constant 0 : i32
    return %arg0, %c0_i32 : i32, i32
  }
  func.func @transform_1(%arg0: i32) -> (i32, i32) {
    %c0_i32 = arith.constant 0 : i32
    %c0_i32_0 = arith.constant 0 : i32
    %c0_i32_1 = arith.constant 0 : i32
    return %c0_i32, %c0_i32_0 : i32, i32
  }
  func.func @transform_2(%arg0: i32) -> (i32, i32) {
    %c0_i32 = arith.constant 0 : i32
    %c0_i32_0 = arith.constant 0 : i32
    %c0_i32_1 = arith.constant 0 : i32
    return %c0_i32, %c0_i32_0 : i32, i32
  }
  func.func @transform_3(%arg0: i32) -> (i32, i32) {
    %c0_i32 = arith.constant 0 : i32
    %c0_i32_0 = arith.constant 0 : i32
    %c0_i32_1 = arith.constant 0 : i32
    return %c0_i32, %c0_i32_0 : i32, i32
  }
  func.func @transform_4(%arg0: i32) -> (i32, i32) {
    %c0_i32 = arith.constant 0 : i32
    %c0_i32_0 = arith.constant 0 : i32
    %c0_i32_1 = arith.constant 0 : i32
    return %c0_i32, %c0_i32_0 : i32, i32
  }
  func.func @transform_5(%arg0: i32) -> (i32, i32) {
    %c0_i32 = arith.constant 0 : i32
    %c0_i32_0 = arith.constant 0 : i32
    return %arg0, %c0_i32 : i32, i32
  }
}

</mosaic_0001>

<bundles_post_ra>
// kernel: tpu_custom_call.1
= control target key start
LH: loop header
LB: loop body
LE: loop exit
PB: predicated region body
PF: predicated region fallthrough
CT: control target
= control target key end

     0   :  { %10 = vsyncpa [#allocation3], 0  ;;  %s1202_s0 = inlined_call_operand.hbm [shape: f32[8,784], index: 0, kind: input, shape index: {}]   ;;  %s1203_s1 = inlined_call_operand.hbm [shape: bf16[784,128], index: 1, kind: input, shape index: {}]   ;;  %s1204_s2 = inlined_call_operand.vmem [shape: f32[1,128], index: 2, kind: input, shape index: {}]   ;;  %s1205_s3 = inlined_call_operand.hbm [shape: bf16[128,128], index: 3, kind: input, shape index: {}]   ;;  %s1206_s4 = inlined_call_operand.vmem [shape: f32[1,128], index: 4, kind: input, shape index: {}]   ;;  %s1207_s5 = inlined_call_operand.hbm [shape: bf16[8,128], index: 5, kind: output, shape index: {}]  }
   0x1   :  { %11 = vsyncpa [#allocation6], 0 }
   0x2   :  { %12 = vsyncpa [#allocation4], 0  ;;  %s1091_s18 = smov [#allocation5]   ;;  %s997_s22 = scalar_lea.hbm %s1203_s1, 6272 }
   0x3   :  { %s28_s19 = sshll.u32 %s1091_s18, 4  ;;  %p998_p0 = scmp.ne.s32.totalorder %s1203_s1, %s997_s22  ;;  %s29_s19 = int_to_ptr.vmem [resolvable:$true] %s28_s19 }
   0x4   :  { %p1001_p1 = scmp.lt.u32.totalorder %s997_s22, %s1203_s1 }
   0x6   :  { %p1003_p2 = pnand %p1001_p1, %p998_p0 }
   0x8   :  { %1006 = shalt.err (!%p1003_p2)
}
   0x9   :  { %s1007_s27 = scalar_lea.vmem %s29_s19, 6272  ;;  %p1012_p4 = scmp.lt.s32.totalorder %s29_s19, %s29_s19 }
   0xa   :  { %p1008_p3 = scmp.ne.s32.totalorder %s29_s19, %s1007_s27  ;;  %p1013_p5 = scmp.lt.s32.totalorder %s1007_s27, %s1007_s27 }
   0xc   :  { %p1014_p6 = por %p1013_p5, %p1012_p4 }
   0xe   :  { %p1015_p7 = pnand %p1014_p6, %p1008_p3 }
  0x10   :  { %1018 = shalt.err (!%p1015_p7)
}
  0x11   :  { %s1092_s28 = smov 64   ;;  %s1093_s29 = smov 4  }
  0x12   :  { %34 = dma.hbm_to_vmem [thread:$0]  %s1203_s1, 6272, %s29_s19, [#allocation6], %s1092_s28, %s1092_s28, %s1093_s29  }
  0x13   :  { %s1094_s7 = smov [#allocation2]   ;;  %s1095_s9 = smov [#allocation7]  }
  0x14   :  { %s19_s8 = sshll.u32 %s1094_s7, 4  ;;  %s42_s10 = sshll.u32 %s1095_s9, 4  ;;  %s20_s8 = int_to_ptr.vmem [resolvable:$true] %s19_s8  ;;  %s43_s10 = int_to_ptr.vmem [resolvable:$true] %s42_s10 }
  0x15   :  { %s1019_s13 = scalar_lea.hbm %s1202_s0, 896 }
  0x16   :  { %p1020_p8 = scmp.ne.s32.totalorder %s1202_s0, %s1019_s13  ;;  %p1023_p9 = scmp.lt.u32.totalorder %s1019_s13, %s1202_s0 }
  0x18   :  { %p1025_p10 = pnand %p1023_p9, %p1020_p8 }
  0x1a   :  { %1028 = shalt.err (!%p1025_p10)
}
  0x1b   :  { %s1029_s1 = scalar_lea.vmem %s20_s8, 896  ;;  %p1034_p12 = scmp.lt.s32.totalorder %s20_s8, %s20_s8 }
  0x1c   :  { %p1030_p11 = scmp.ne.s32.totalorder %s20_s8, %s1029_s1  ;;  %p1035_p13 = scmp.lt.s32.totalorder %s1029_s1, %s1029_s1 }
  0x1e   :  { %p1036_p0 = por %p1035_p13, %p1034_p12 }
  0x20   :  { %p1037_p1 = pnand %p1036_p0, %p1030_p11 }
  0x22   :  { %1040 = shalt.err (!%p1037_p1)
}
  0x23   :  { %22 = dma.hbm_to_vmem [thread:$0]  %s1202_s0, 896, %s20_s8, [#allocation3]  }
  0x24   :  { %s1041_s22 = scalar_lea.hbm %s1205_s3, 1024 }
  0x25   :  { %p1042_p2 = scmp.ne.s32.totalorder %s1205_s3, %s1041_s22  ;;  %p1045_p3 = scmp.lt.u32.totalorder %s1041_s22, %s1205_s3 }
  0x27   :  { %p1047_p4 = pnand %p1045_p3, %p1042_p2 }
  0x29   :  { %1050 = shalt.err (!%p1047_p4)
}
  0x2a   :  { %s1051_s27 = scalar_lea.vmem %s43_s10, 1024  ;;  %p1056_p6 = scmp.lt.s32.totalorder %s43_s10, %s43_s10 }
  0x2b   :  { %p1052_p5 = scmp.ne.s32.totalorder %s43_s10, %s1051_s27  ;;  %p1057_p7 = scmp.lt.s32.totalorder %s1051_s27, %s1051_s27 }
  0x2d   :  { %p1058_p8 = por %p1057_p7, %p1056_p6 }
  0x2f   :  { %p1059_p9 = pnand %p1058_p8, %p1052_p5 }
  0x31   :  { %1062 = shalt.err (!%p1059_p9)
}
  0x32   :  { %48 = dma.hbm_to_vmem [thread:$0]  %s1205_s3, 1024, %s43_s10, [#allocation6], %s1092_s28, %s1092_s28, %s1093_s29  }
  0x33   :  { %1085 = dma.done.wait [#allocation3], 896  }
  0x34   :  { %1086 = vsyncadd [#allocation3], 4294966400 }
  0x35   :  { %1087 = dma.done.wait [#allocation6], 7296  }
  0x36   :  { %1088 = vsyncadd [#allocation6], 4294960000  ;;  %v940_v0 = vld [vmem:[#allocation5 + $0x40] sm:$0xff]   ;;  %v944_v4 = vld [vmem:[#allocation5 + $0x48] sm:$0xff]   ;;  %v1096_v44 = vmov 0.0   ;;  %vm1097_vm0 = vmmov 0  }
  0x37   :  { %v941_v1 = vld [vmem:[#allocation5] sm:$0xff]   ;;  %829 = vmatprep.subr.bf16.mxu0 %v940_v0  ;;  %v945_v5 = vld [vmem:[#allocation5 + $0x8] sm:$0xff]   ;;  %v948_v8 = vld [vmem:[#allocation5 + $0x50] sm:$0xff]   ;;  %vm474_vm1 = vcmask 130048   ;;  %s1098_s6 = smov [#allocation8]  }
  0x38   :  { %v942_v2 = vld [vmem:[#allocation5 + $0xc0] sm:$0xff]   ;;  %830 = vmatpush3.bf16.msra.mxu0 %v941_v1  ;;  %v946_v6 = vld [vmem:[#allocation5 + $0xc8] sm:$0xff]   ;;  %v949_v9 = vld [vmem:[#allocation5 + $0x10] sm:$0xff]   ;;  %s759_s7 = sshll.u32 %s1098_s6, 4  ;;  %s760_s7 = int_to_ptr.vmem [resolvable:$true] %s759_s7 }
  0x39   :  { %v943_v3 = vld [vmem:[#allocation5 + $0x80] sm:$0xff]   ;;  %851 = vmatprep.subr.bf16.mxu1 %v942_v2  ;;  %831 = vmatprep.subr.bf16.mxu0 %v944_v4  ;;  %v947_v7 = vld [vmem:[#allocation5 + $0x88] sm:$0xff]   ;;  %v950_v10 = vld [vmem:[#allocation5 + $0xd0] sm:$0xff]   ;;  %s1063_s8 = scalar_lea.vmem %s760_s7, 64  ;;  %p1068_p11 = scmp.lt.s32.totalorder %s760_s7, %s760_s7 }
  0x3a   :  { %852 = vmatpush3.bf16.msra.mxu1 %v943_v3  ;;  %v951_v11 = vld [vmem:[#allocation5 + $0x90] sm:$0xff]   ;;  %v952_v12 = vld [vmem:[#allocation5 + $0x58] sm:$0xff]   ;;  %v956_v16 = vld [vmem:[#allocation5 + $0x60] sm:$0xff]   ;;  %p1064_p10 = scmp.ne.s32.totalorder %s760_s7, %s1063_s8  ;;  %p1069_p12 = scmp.lt.s32.totalorder %s1063_s8, %s1063_s8 }
  0x3b   :  { %853 = vmatprep.subr.bf16.mxu1 %v946_v6  ;;  %v953_v13 = vld [vmem:[#allocation5 + $0x18] sm:$0xff]   ;;  %v957_v17 = vld [vmem:[#allocation5 + $0x20] sm:$0xff]   ;;  %v960_v20 = vld [vmem:[#allocation5 + $0x68] sm:$0xff]  }
  0x3c   :  { %832 = vmatpush3.bf16.msra.mxu0 %v945_v5  ;;  %v954_v14 = vld [vmem:[#allocation5 + $0xd8] sm:$0xff]   ;;  %v958_v18 = vld [vmem:[#allocation5 + $0xe0] sm:$0xff]   ;;  %v961_v21 = vld [vmem:[#allocation5 + $0x28] sm:$0xff]   ;;  %p1070_p13 = por %p1069_p12, %p1068_p11 }
  0x3d   :  { %833 = vmatprep.subr.bf16.mxu0 %v948_v8  ;;  %v955_v15 = vld [vmem:[#allocation5 + $0x98] sm:$0xff]   ;;  %v959_v19 = vld [vmem:[#allocation5 + $0xa0] sm:$0xff]   ;;  %v962_v22 = vld [vmem:[#allocation5 + $0xe8] sm:$0xff]  }
  0x3e   :  { %854 = vmatpush3.bf16.msra.mxu1 %v947_v7  ;;  %v963_v23 = vld [vmem:[#allocation5 + $0xa8] sm:$0xff]   ;;  %v964_v24 = vld [vmem:[#allocation5 + $0x70] sm:$0xff]   ;;  %v968_v28 = vld [vmem:[#allocation5 + $0x78] sm:$0xff]   ;;  %p1071_p0 = pnand %p1070_p13, %p1064_p10 }
  0x3f   :  { %855 = vmatprep.subr.bf16.mxu1 %v950_v10  ;;  %v965_v25 = vld [vmem:[#allocation5 + $0x30] sm:$0xff]   ;;  %v969_v29 = vld [vmem:[#allocation5 + $0x38] sm:$0xff]   ;;  %v61_v34 = vld [vmem:[#allocation2] sm:$0xff] }
  0x40   :  { %834 = vmatpush3.bf16.msra.mxu0 %v949_v9  ;;  %v966_v26 = vld [vmem:[#allocation5 + $0xf0] sm:$0xff]   ;;  %v970_v30 = vld [vmem:[#allocation5 + $0xf8] sm:$0xff]   ;;  %v68_v35 = vpack.c.bf16 %v61_v34, %v61_v34  ;;  %v972_v36 = vld [vmem:[#allocation5 + $0x140] sm:$0xff]  }
  0x41   :  { %835 = vmatprep.subr.bf16.mxu0 %v952_v12  ;;  %v967_v27 = vld [vmem:[#allocation5 + $0xb0] sm:$0xff]   ;;  %v971_v33 = vld [vmem:[#allocation5 + $0xb8] sm:$0xff]   ;;  %v64_v37 = vld [vmem:[#allocation2 + $0x18] sm:$0xff] }
  0x42   :  { %856 = vmatpush3.bf16.msra.mxu1 %v951_v11  ;;  %v62_v31 = vld [vmem:[#allocation2 + $0x8] sm:$0xff]  ;;  %v71_v38 = vpack.c.bf16 %v64_v37, %v64_v37  ;;  %v973_v39 = vld [vmem:[#allocation5 + $0x100] sm:$0xff]   ;;  %v63_v40 = vld [vmem:[#allocation2 + $0x10] sm:$0xff] }
  0x43   :  { %857 = vmatprep.subr.bf16.mxu1 %v954_v14  ;;  %v69_v32 = vpack.c.bf16 %v62_v31, %v62_v31  ;;  %v70_v41 = vpack.c.bf16 %v63_v40, %v63_v40  ;;  %v974_v42 = vld [vmem:[#allocation5 + $0x148] sm:$0xff]   ;;  %v976_v45 = vld [vmem:[#allocation5 + $0x150] sm:$0xff]   ;;  %v978_v47 = vld [vmem:[#allocation5 + $0x158] sm:$0xff]  }
  0x44   :  { %836 = vmatpush3.bf16.msra.mxu0 %v953_v13  ;;  %550 = vmatprep.mubr.bf16.mxu1 %v71_v38  ;;  %v975_v43 = vld [vmem:[#allocation5 + $0x108] sm:$0xff]   ;;  %v977_v46 = vld [vmem:[#allocation5 + $0x110] sm:$0xff]   ;;  %v979_v48 = vld [vmem:[#allocation5 + $0x118] sm:$0xff]  }
  0x45   :  { %837 = vmatprep.subr.bf16.mxu0 %v956_v16  ;;  %510 = vmatprep.mubr.bf16.mxu0 %v69_v32  ;;  %v980_v49 = vld [vmem:[#allocation5 + $0x160] sm:$0xff]   ;;  %v982_v51 = vld [vmem:[#allocation5 + $0x168] sm:$0xff]   ;;  %v66_v54 = vld [vmem:[#allocation2 + $0x28] sm:$0xff] }
  0x46   :  { %858 = vmatpush3.bf16.msra.mxu1 %v955_v15  ;;  %v981_v50 = vld [vmem:[#allocation5 + $0x120] sm:$0xff]   ;;  %v983_v52 = vld [vmem:[#allocation5 + $0x128] sm:$0xff]   ;;  %v984_v55 = vld [vmem:[#allocation5 + $0x170] sm:$0xff]   ;;  %v73_v56 = vpack.c.bf16 %v66_v54, %v66_v54 }
  0x47   :  { %859 = vmatprep.subr.bf16.mxu1 %v958_v18  ;;  %v988_v53 = vld [vmem:[#allocation5 + $0x180] sm:$0xff]   ;;  %v67_v57 = vld [vmem:[#allocation2 + $0x30] sm:$0xff]  ;;  %v985_v59 = vld [vmem:[#allocation5 + $0x130] sm:$0xff]  }
  0x48   :  { %838 = vmatpush3.bf16.msra.mxu0 %v957_v17  ;;  %v74_v58 = vpack.c.bf16 %v67_v57, %v67_v57  ;;  %v986_v60 = vld [vmem:[#allocation5 + $0x178] sm:$0xff]   ;;  %v65_v62 = vld [vmem:[#allocation2 + $0x20] sm:$0xff]  ;;  %v990_v1 = vld [vmem:[#allocation7 + $0x8] sm:$0xff]  }
  0x49   :  { %839 = vmatprep.subr.bf16.mxu0 %v960_v20  ;;  %v987_v61 = vld [vmem:[#allocation5 + $0x138] sm:$0xff]   ;;  %v72_v63 = vpack.c.bf16 %v65_v62, %v65_v62  ;;  %v989_v0 = vld [vmem:[#allocation7] sm:$0xff]   ;;  %v992_v3 = vld [vmem:[#allocation7 + $0x18] sm:$0xff]  }
  0x4a   :  { %860 = vmatpush3.bf16.msra.mxu1 %v959_v19  ;;  %v991_v2 = vld [vmem:[#allocation7 + $0x10] sm:$0xff]   ;;  %v993_v4 = vld [vmem:[#allocation7 + $0x20] sm:$0xff]   ;;  %v994_v5 = vld [vmem:[#allocation7 + $0x28] sm:$0xff]  }
  0x4b   :  { %861 = vmatprep.subr.bf16.mxu1 %v962_v22  ;;  %v995_v6 = vld [vmem:[#allocation7 + $0x30] sm:$0xff]   ;;  %v996_v7 = vld [vmem:[#allocation7 + $0x38] sm:$0xff]   ;;  %v769_v9 = vld [vmem:[%s1204_s2] ss:$0 sm:$0xff] }
  0x4c   :  { %840 = vmatpush3.bf16.msra.mxu0 %v961_v21  ;;  %v820_v34 = vld [vmem:[%s1206_s4] ss:$0 sm:$0xff] }
  0x4d   :  { %841 = vmatprep.subr.bf16.mxu0 %v964_v24 }
  0x4e   :  { %862 = vmatpush3.bf16.msra.mxu1 %v963_v23 }
  0x4f   :  { %863 = vmatprep.subr.bf16.mxu1 %v966_v26 }
  0x50   :  { %842 = vmatpush3.bf16.msra.mxu0 %v965_v25 }
  0x51   :  { %843 = vmatprep.subr.bf16.mxu0 %v968_v28 }
  0x52   :  { %864 = vmatpush3.bf16.msra.mxu1 %v967_v27 }
  0x53   :  { %865 = vmatprep.subr.bf16.mxu1 %v970_v30 }
  0x54   :  { %844 = vmatpush3.bf16.msra.mxu0 %v969_v29 }
  0x55   :  { %873 = vmatprep.subr.bf16.mxu0 %v972_v36 }
  0x56   :  { %866 = vmatpush3.bf16.msra.mxu1 %v971_v33 }
  0x57   :  { %511 = vmatmul.mubr.bf16.vlgmr.msra.gmra.mrb[0].mxu0 %v68_v35  ;;  %906 = vmatprep.subr.bf16.mxu1 %v1096_v44 }
  0x58   :  { %874 = vmatpush3.bf16.msra.mxu0 %v973_v39  ;;  %590 = vmatprep.mubr.bf16.mxu0 %v73_v56 }
  0x59   :  { %551 = vmatmul.mubr.bf16.vlgmr.msra.gmra.mrb[0].mxu1 %v70_v41  ;;  %875 = vmatprep.subr.bf16.mxu0 %v974_v42 }
  0x5a   :  { %908 = vmatprep.mubr.msk.bf16.mxu1 %vm1097_vm0, %v1096_v44  ;;  %907 = vmatpush3.bf16.msra.mxu1 %v988_v53 }
  0x5b   :  { %912 = vmatprep.subr.bf16.mxu1 %v1096_v44 }
  0x5c   :  { %876 = vmatpush3.bf16.msra.mxu0 %v975_v43 }
  0x5d   :  { %877 = vmatprep.subr.bf16.mxu0 %v976_v45 }
  0x60   :  { %878 = vmatpush3.bf16.msra.mxu0 %v977_v46 }
  0x61   :  { %879 = vmatprep.subr.bf16.mxu0 %v978_v47  ;;  %909 = vmatmul.mubr.msk.bf16.vlgmr.msra.gmra.mrb[4].mxu1 %vm474_vm1, %v74_v58 }
  0x62   :  { %928 = vmatprep.mubr.msk.bf16.mxu1 %vm1097_vm0, %v1096_v44  ;;  %913 = vmatpush3.bf16.msra.mxu1 %v989_v0 }
  0x63   :  { %914 = vmatprep.subr.bf16.mxu1 %v1096_v44 }
  0x64   :  { %880 = vmatpush3.bf16.msra.mxu0 %v979_v48 }
  0x65   :  { %881 = vmatprep.subr.bf16.mxu0 %v980_v49 }
  0x66   :  { %915 = vmatpush3.bf16.msra.mxu1 %v990_v1 }
  0x67   :  { %916 = vmatprep.subr.bf16.mxu1 %v1096_v44 }
  0x68   :  { %882 = vmatpush3.bf16.msra.mxu0 %v981_v50 }
  0x69   :  { %883 = vmatprep.subr.bf16.mxu0 %v982_v51 }
  0x6a   :  { %917 = vmatpush3.bf16.msra.mxu1 %v991_v2 }
  0x6b   :  { %918 = vmatprep.subr.bf16.mxu1 %v1096_v44 }
  0x6c   :  { %884 = vmatpush3.bf16.msra.mxu0 %v983_v52 }
  0x6d   :  { %885 = vmatprep.subr.bf16.mxu0 %v984_v55 }
  0x6e   :  { %919 = vmatpush3.bf16.msra.mxu1 %v992_v3 }
  0x6f   :  { %920 = vmatprep.subr.bf16.mxu1 %v1096_v44 }
  0x70   :  { %886 = vmatpush3.bf16.msra.mxu0 %v985_v59 }
  0x71   :  { %887 = vmatprep.subr.bf16.mxu0 %v986_v60 }
  0x72   :  { %921 = vmatpush3.bf16.msra.mxu1 %v993_v4 }
  0x73   :  { %922 = vmatprep.subr.bf16.mxu1 %v1096_v44 }
  0x74   :  { %888 = vmatpush3.bf16.msra.mxu0 %v987_v61 }
  0x76   :  { %923 = vmatpush3.bf16.msra.mxu1 %v994_v5 }
  0x77   :  { %591 = vmatmul.mubr.bf16.vlgmr.msra.gmra.mrb[4].mxu0 %v72_v63  ;;  %924 = vmatprep.subr.bf16.mxu1 %v1096_v44 }
  0x7a   :  { %925 = vmatpush3.bf16.msra.mxu1 %v995_v6 }
  0x7b   :  { %926 = vmatprep.subr.bf16.mxu1 %v1096_v44 }
  0x7e   :  { %927 = vmatpush3.bf16.msra.mxu1 %v996_v7 }
 0x12a   :  { %v845_v8 = vpop.f32.mrb[0].mxu0 }
 0x12b   :  { %v846_v10 = vpop.f32.mrb[1].mxu0 }
 0x12c   :  { %v847_v11 = vadd.f32 %v846_v10, %v845_v8  ;;  %v848_v12 = vpop.f32.mrb[2].mxu0  ;;  %v867_v13 = vpop.f32.mrb[0].mxu1 }
 0x12d   :  { %v849_v14 = vpop.f32.mrb[3].mxu0  ;;  %v868_v16 = vpop.f32.mrb[1].mxu1 }
 0x12e   :  { %v513_v15 = vadd.f32 %v847_v11, %v769_v9  ;;  %v869_v17 = vadd.f32 %v868_v16, %v867_v13  ;;  %v870_v18 = vpop.f32.mrb[2].mxu1 }
 0x12f   :  { %v871_v19 = vpop.f32.mrb[3].mxu1 }
 0x130   :  { %v553_v20 = vadd.f32 %v869_v17, %v513_v15 }
 0x134   :  { %v632_v21 = vpop.f32.mrb[4].mxu1 }
 0x135   :  { %v910_v22 = vpop.f32.mrb[5].mxu1 }
 0x136   :  { %v635_v23 = vpop.f32.mrb[6].mxu1 }
 0x137   :  { %v911_v24 = vpop.f32.mrb[7].mxu1 }
 0x14a   :  { %v889_v25 = vpop.f32.mrb[4].mxu0 }
 0x14b   :  { %v890_v26 = vpop.f32.mrb[5].mxu0 }
 0x14c   :  { %v891_v27 = vadd.f32 %v890_v26, %v889_v25  ;;  %v892_v28 = vpop.f32.mrb[6].mxu0 }
 0x14d   :  { %v893_v29 = vpop.f32.mrb[7].mxu0 }
 0x14e   :  { %v593_v30 = vadd.f32 %v891_v27, %v553_v20 }
 0x150   :  { %v633_v31 = vadd.f32 %v632_v21, %v593_v30 }
 0x152   :  { %v638_v32 = vmax.f32 %v633_v31, 0.0 }
 0x154   :  { %v639_v33 = vpack.c.bf16 %v638_v32, %v638_v32 }
 0x156   :  { %929 = vmatmul.mubr.bf16.vlgmr.msra.gmra.mrb[8].mxu1 %v639_v33 }
 0x229   :  { %v745_v35 = vpop.f32.mrb[8].mxu1 }
 0x22a   :  { %v746_v36 = vadd.f32 %v820_v34, %v745_v35  ;;  %v930_v37 = vpop.f32.mrb[9].mxu1 }
 0x22b   :  { %v748_v38 = vpop.f32.mrb[10].mxu1 }
 0x22c   :  { %v751_v39 = vpack.c.bf16 %v746_v36, %v746_v36  ;;  %v931_v40 = vpop.f32.mrb[11].mxu1 }
 0x22e   :  { %752 = vst [vmem:[#allocation8] sm:$0xf] %v751_v39 }
 0x22f   :  { %1074 = shalt.err (!%p1071_p0)
}
 0x230   :  { %s1075_s4 = scalar_lea.hbm %s1207_s5, 64 }
 0x231   :  { %p1076_p1 = scmp.ne.s32.totalorder %s1207_s5, %s1075_s4  ;;  %p1079_p2 = scmp.lt.u32.totalorder %s1075_s4, %s1207_s5 }
 0x233   :  { %p1081_p3 = pnand %p1079_p2, %p1076_p1 }
 0x235   :  { %1084 = shalt.err (!%p1081_p3)
}
 0x236   :  { %762 = dma.vmem_to_hbm [thread:$0]  %s760_s7, 64, %s1207_s5, [#allocation4]  }
 0x237   :  { %1089 = dma.done.wait [#allocation4], 64  }
 0x238   :  { %1090 = vsyncadd [#allocation4], 4294967232 }
 0x239   :  { %766 = vsyncpa [#allocation3], 1 }
 0x23a   :  { %767 = vsyncpa [#allocation6], 1 }
 0x23b   :  { %768 = vsyncpa [#allocation4], 1 }

</bundles_post_ra>
